<compile_context>
chip_gen: v7x
topology: tpu7x:2x2x1
jax: 0.10.0
libtpu: 0.0.40
codegen_flags: <defaults>
</compile_context>

<pallas_src>
import functools

import jax
import jax.numpy as jnp
import numpy as np
from jax.experimental import pallas as pl
from jax.experimental.pallas import tpu as pltpu


# -----------------------------------------------------------------------------
# Fused Pallas kernel: text head + image head + fusion, single invocation
# -----------------------------------------------------------------------------
def _mml_fused_kernel(emb_ref, mask_ref, patch_ref, wtxt_ref, wimg_ref,
                      small_ref, out_ref, *, hw, hdim, ncls, kp, cout):
    """Fused MMLBase_vt forward.

    emb:    (B, S, H)              mask:  (B, S)
    patch:  (B*HW, Kp)             wtxt:  (H, H+C)       [wp | wct]
    wimg:   (Kp+Cout, max(Cout,C)) [wcv ; wci]
    small:  (8, >=128)             rows: bp, bct, bcv, bci
    out:    (B, 3*C)               [fusion | txt | img]
    """
    # ---------------- text head ----------------
    emb = emb_ref[...]                                        # (B, S, H)
    mask = mask_ref[...]                                      # (B, S)
    B = emb.shape[0]

    # NOTE: an all-zero mask row gives denom == 0 -> NaN (same semantics as the
    # PyTorch masked mean); callers guarantee a non-empty mask.
    denom = jnp.sum(mask, axis=1, keepdims=True)              # (B, 1)
    # Masked mean pool: VPU multiply + sublane sum (emb is ~half a vreg here;
    # no batched dot_general needed).
    pooled = jnp.sum(emb * mask[:, :, None], axis=1) / denom  # (B, H)

    wtxt = wtxt_ref[...]                                      # (H, H+C)
    wp = wtxt[:, :hdim]                                       # (H, H)
    wct = wtxt[:, hdim:hdim + ncls]                           # (H, C)
    small = small_ref[...]                                    # (8, lanes)
    bp = small[0:1, :hdim]                                    # (1, H)
    bct = small[1:2, :ncls]                                   # (1, C)
    bcv = small[2:3, :cout]                                   # (1, Cout)
    bci = small[3:4, :ncls]                                   # (1, C)

    hidden = jnp.tanh(
        jnp.dot(pooled, wp, preferred_element_type=jnp.float32) + bp)   # (B, H)
    txt_logits = (
        jnp.dot(hidden, wct, preferred_element_type=jnp.float32) + bct)  # (B, C)

    # ---------------- image head ----------------
    patches = patch_ref[...]                                  # (B*HW, Kp)
    wimg = wimg_ref[...]                                      # (Kp+Cout, wcols)
    wcv = wimg[:kp, :cout]                                    # (Kp, Cout)
    wci = wimg[kp:kp + cout, :ncls]                           # (Cout, C)

    feat = jnp.dot(patches, wcv, preferred_element_type=jnp.float32) + bcv
    feat = jnp.maximum(feat, 0.0)                             # (B*HW, Cout)
    # Global average pool: split the leading (sublane) dim and reduce over HW —
    # no O(B^2*HW) block-diagonal matmul, no iota/where mask build.
    pooled_i = jnp.sum(feat.reshape(B, hw, cout), axis=1) * (1.0 / hw)  # (B, Cout)
    img_logits = (
        jnp.dot(pooled_i, wci, preferred_element_type=jnp.float32) + bci)  # (B, C)

    # ---------------- fusion + single merged store ----------------
    fusion = (txt_logits + img_logits) * 0.5
    out_ref[...] = jnp.concatenate([fusion, txt_logits, img_logits], axis=1)


def mml_fused(emb, mask, patches2d, w_txt, w_img, small,
              *, hw, hdim, ncls, kp, cout):
    B, S, H = emb.shape
    BHW, Kp = patches2d.shape
    z2 = lambda i: (0, 0)
    z3 = lambda i: (0, 0, 0)
    kern = functools.partial(_mml_fused_kernel, hw=hw, hdim=hdim, ncls=ncls,
                             kp=kp, cout=cout)
    return pl.pallas_call(
        kern,
        out_shape=jax.ShapeDtypeStruct((B, 3 * ncls), jnp.float32),
        grid=(1,),
        in_specs=[
            pl.BlockSpec((B, S, H), z3),
            pl.BlockSpec((B, S), z2),
            pl.BlockSpec((BHW, Kp), z2),
            pl.BlockSpec(w_txt.shape, z2),
            pl.BlockSpec(w_img.shape, z2),
            pl.BlockSpec(small.shape, z2),
        ],
        out_specs=pl.BlockSpec((B, 3 * ncls), z2),
        compiler_params=pltpu.CompilerParams(
            dimension_semantics=("arbitrary",)),
    )(emb, mask, patches2d, w_txt, w_img, small)


# -----------------------------------------------------------------------------
# Glue (embedding gather, im2col, parameter packing) — plain JAX
# -----------------------------------------------------------------------------
def im2col_3x3_same(x_nchw):
    """(B, C, H, W) -> (B, H*W, C*9) patches for a 3x3 stride-1 'same' conv."""
    B, C, H, W = x_nchw.shape
    xp = jnp.pad(x_nchw, ((0, 0), (0, 0), (1, 1), (1, 1)))
    cols = []
    for di in range(3):
        for dj in range(3):
            cols.append(xp[:, :, di:di + H, dj:dj + W])       # (B, C, H, W)
    patches = jnp.stack(cols, axis=2)                         # (B, C, 9, H, W)
    patches = patches.transpose(0, 3, 4, 1, 2)                # (B, H, W, C, 9)
    return patches.reshape(B, H * W, C * 9)


def init_params(key, vocab=32, seq=8, hidden=32, n_classes=4, cin=3, cout=8):
    ks = jax.random.split(key, 10)
    s = 0.02
    return {
        # text classifier (BertClf stand-in)
        "word_emb": s * jax.random.normal(ks[0], (vocab, hidden), jnp.float32),
        "pos_emb": s * jax.random.normal(ks[1], (seq, hidden), jnp.float32),
        "seg_emb": s * jax.random.normal(ks[2], (2, hidden), jnp.float32),
        "pool_w": s * jax.random.normal(ks[3], (hidden, hidden), jnp.float32),
        "pool_b": jnp.zeros((1, hidden), jnp.float32),
        "txt_clf_w": s * jax.random.normal(ks[4], (hidden, n_classes), jnp.float32),
        "txt_clf_b": jnp.zeros((1, n_classes), jnp.float32),
        # image classifier (ImageClf stand-in)
        "conv_w": s * jax.random.normal(ks[5], (cout, cin, 3, 3), jnp.float32),
        "conv_b": jnp.zeros((1, cout), jnp.float32),
        "img_clf_w": s * jax.random.normal(ks[6], (cout, n_classes), jnp.float32),
        "img_clf_b": jnp.zeros((1, n_classes), jnp.float32),
    }


def mml_base_vt_forward(params, txt, mask, segment, img):
    """Returns (fusion_logits, txt_logits, img_logits) like the PyTorch module."""
    # ---- text-path glue ----------------------------------------------------
    # TODO(synk): embedding gather kept in plain JAX (no clean small-gather
    # Pallas equivalent); everything after it runs in the fused kernel.
    emb = (
        jnp.take(params["word_emb"], txt, axis=0)
        + params["pos_emb"][None, :, :]
        + jnp.take(params["seg_emb"], segment, axis=0)
    ).astype(jnp.float32)                                     # (B, S, H)
    mask_f = mask.astype(jnp.float32)                         # (B, S)
    B, S, H = emb.shape
    C = params["txt_clf_w"].shape[1]

    # ---- image-path glue ---------------------------------------------------
    patches = im2col_3x3_same(img.astype(jnp.float32))        # (B, HW, K)
    _, HW, K = patches.shape
    Kp = ((K + 127) // 128) * 128                             # lane-dense K (27 -> 128)
    patches2d = patches.reshape(B * HW, K)
    patches2d = jnp.pad(patches2d, ((0, 0), (0, Kp - K)))     # (B*HW, Kp)
    cout = params["conv_w"].shape[0]
    w_mat = params["conv_w"].reshape(cout, -1).T              # (K, Cout)
    w_mat = jnp.pad(w_mat, ((0, Kp - K), (0, 0)))             # zero rows: math unchanged

    # ---- parameter packing: 11 small tensors -> 3 slabs --------------------
    w_txt = jnp.concatenate(
        [params["pool_w"], params["txt_clf_w"]], axis=1)      # (H, H+C)
    wcols = max(cout, C)
    wcv_p = jnp.pad(w_mat, ((0, 0), (0, wcols - cout)))
    wci_p = jnp.pad(params["img_clf_w"], ((0, 0), (0, wcols - C)))
    w_img = jnp.concatenate([wcv_p, wci_p], axis=0)           # (Kp+Cout, wcols)

    lanes = ((max(H, C, cout, 128) + 127) // 128) * 128
    small = jnp.zeros((8, lanes), jnp.float32)
    small = small.at[0, :H].set(params["pool_b"][0])
    small = small.at[1, :C].set(params["txt_clf_b"][0])
    small = small.at[2, :cout].set(params["conv_b"][0])
    small = small.at[3, :C].set(params["img_clf_b"][0])

    # ---- single fused kernel: both heads + fusion, one merged output -------
    out = mml_fused(emb, mask_f, patches2d, w_txt, w_img, small,
                    hw=HW, hdim=H, ncls=C, kp=Kp, cout=cout)
    fusion_logits = out[:, 0:C]
    txt_logits = out[:, C:2 * C]
    img_logits = out[:, 2 * C:3 * C]
    return fusion_logits, txt_logits, img_logits


# Pure-JAX reference for verification
def reference_forward(params, txt, mask, segment, img):
    emb = (
        jnp.take(params["word_emb"], txt, axis=0)
        + params["pos_emb"][None, :, :]
        + jnp.take(params["seg_emb"], segment, axis=0)
    ).astype(jnp.float32)
    m = mask.astype(jnp.float32)[:, :, None]
    pooled = jnp.sum(emb * m, axis=1) / jnp.sum(m, axis=1)
    hidden = jnp.tanh(pooled @ params["pool_w"] + params["pool_b"])
    txt_logits = hidden @ params["txt_clf_w"] + params["txt_clf_b"]

    patches = im2col_3x3_same(img.astype(jnp.float32))
    cout = params["conv_w"].shape[0]
    w_mat = params["conv_w"].reshape(cout, -1).T
    feat = jnp.maximum(patches @ w_mat + params["conv_b"][None], 0.0)
    pooled_i = jnp.mean(feat, axis=1)
    img_logits = pooled_i @ params["img_clf_w"] + params["img_clf_b"]

    fusion = (txt_logits + img_logits) / 2.0
    return fusion, txt_logits, img_logits


if __name__ == "__main__":
    key = jax.random.PRNGKey(0)
    kp_, k1, k2, k3, k4 = jax.random.split(key, 5)

    B, S, VOCAB, HIDDEN, NCLS = 2, 8, 32, 32, 4
    CIN, H, W = 3, 16, 16

    params = init_params(kp_, vocab=VOCAB, seq=S, hidden=HIDDEN,
                         n_classes=NCLS, cin=CIN, cout=8)

    txt = jax.random.randint(k1, (B, S), 0, VOCAB, dtype=jnp.int32)
    mask = (jax.random.uniform(k2, (B, S)) > 0.2).astype(jnp.float32)
    mask = mask.at[:, 0].set(1.0)  # guarantee non-empty mask
    segment = jax.random.randint(k3, (B, S), 0, 2, dtype=jnp.int32)
    img = jax.random.normal(k4, (B, CIN, H, W), jnp.float32)   # NCHW like PyTorch

    fwd = jax.jit(functools.partial(mml_base_vt_forward, params))
    fusion_logits, txt_logits, img_logits = fwd(txt, mask, segment, img)
    jax.block_until_ready((fusion_logits, txt_logits, img_logits))

    ref_fusion, ref_txt, ref_img = reference_forward(params, txt, mask, segment, img)
    np.testing.assert_allclose(np.asarray(txt_logits), np.asarray(ref_txt),
                               rtol=1e-5, atol=1e-5)
    np.testing.assert_allclose(np.asarray(img_logits), np.asarray(ref_img),
                               rtol=1e-5, atol=1e-5)
    np.testing.assert_allclose(np.asarray(fusion_logits), np.asarray(ref_fusion),
                               rtol=1e-5, atol=1e-5)

    print("KERNEL_OK")
</pallas_src>

<mosaic_0001>
module attributes {stable_mosaic.version = 11 : i64} {
  func.func @_mml_fused_kernel(%arg0: i32, %arg1: memref<2x8x32xf32, #tpu.memory_space<vmem>>, %arg2: memref<2x8xf32, #tpu.memory_space<vmem>>, %arg3: memref<512x128xf32, #tpu.memory_space<vmem>>, %arg4: memref<32x36xf32, #tpu.memory_space<vmem>>, %arg5: memref<136x8xf32, #tpu.memory_space<vmem>>, %arg6: memref<8x128xf32, #tpu.memory_space<vmem>>, %arg7: memref<2x12xf32, #tpu.memory_space<vmem>>) attributes {dimension_semantics = [#tpu.dimension_semantics<arbitrary>], iteration_bounds = array<i64: 1>, scalar_prefetch = 0 : i64, scratch_operands = 0 : i64, tpu.core_type = #tpu.core_type<tc>, window_params = [{pipeline_mode = #tpu.pipeline_mode<synchronous>, transform_indices = @transform_0, window_bounds = array<i64: 2, 8, 32>}, {pipeline_mode = #tpu.pipeline_mode<synchronous>, transform_indices = @transform_1, window_bounds = array<i64: 2, 8>}, {pipeline_mode = #tpu.pipeline_mode<synchronous>, transform_indices = @transform_2, window_bounds = array<i64: 512, 128>}, {pipeline_mode = #tpu.pipeline_mode<synchronous>, transform_indices = @transform_3, window_bounds = array<i64: 32, 36>}, {pipeline_mode = #tpu.pipeline_mode<synchronous>, transform_indices = @transform_4, window_bounds = array<i64: 136, 8>}, {pipeline_mode = #tpu.pipeline_mode<synchronous>, transform_indices = @transform_5, window_bounds = array<i64: 8, 128>}, {pipeline_mode = #tpu.pipeline_mode<synchronous>, transform_indices = @transform_6, window_bounds = array<i64: 2, 12>}]} {
    %c0 = arith.constant 0 : index
    %c0_0 = arith.constant 0 : index
    %c0_1 = arith.constant 0 : index
    %0 = vector.load %arg1[%c0, %c0_0, %c0_1] : memref<2x8x32xf32, #tpu.memory_space<vmem>>, vector<2x8x32xf32>
    %c0_2 = arith.constant 0 : index
    %c0_3 = arith.constant 0 : index
    %1 = vector.load %arg2[%c0_2, %c0_3] : memref<2x8xf32, #tpu.memory_space<vmem>>, vector<2x8xf32>
    %cst = arith.constant dense<0.000000e+00> : vector<2xf32>
    %2 = vector.multi_reduction <add>, %1, %cst [1] : vector<2x8xf32> to vector<2xf32>
    %3 = vector.shape_cast %2 : vector<2xf32> to vector<2x1xf32>
    %4 = vector.shape_cast %1 : vector<2x8xf32> to vector<2x8x1xf32>
    %5 = vector.broadcast %4 : vector<2x8x1xf32> to vector<2x8x32xf32>
    %6 = arith.mulf %0, %5 : vector<2x8x32xf32>
    %cst_4 = arith.constant dense<0.000000e+00> : vector<2x32xf32>
    %7 = vector.multi_reduction <add>, %6, %cst_4 [1] : vector<2x8x32xf32> to vector<2x32xf32>
    %8 = vector.broadcast %3 : vector<2x1xf32> to vector<2x32xf32>
    %9 = arith.divf %7, %8 : vector<2x32xf32>
    %c0_5 = arith.constant 0 : index
    %c0_6 = arith.constant 0 : index
    %10 = vector.load %arg4[%c0_5, %c0_6] : memref<32x36xf32, #tpu.memory_space<vmem>>, vector<32x36xf32>
    %11 = vector.extract_strided_slice %10 {offsets = [0, 0], sizes = [32, 32], strides = [1, 1]} : vector<32x36xf32> to vector<32x32xf32>
    %12 = vector.extract_strided_slice %10 {offsets = [0, 32], sizes = [32, 4], strides = [1, 1]} : vector<32x36xf32> to vector<32x4xf32>
    %c0_7 = arith.constant 0 : index
    %c0_8 = arith.constant 0 : index
    %13 = vector.load %arg6[%c0_7, %c0_8] : memref<8x128xf32, #tpu.memory_space<vmem>>, vector<8x128xf32>
    %14 = vector.extract_strided_slice %13 {offsets = [0, 0], sizes = [1, 32], strides = [1, 1]} : vector<8x128xf32> to vector<1x32xf32>
    %15 = vector.extract_strided_slice %13 {offsets = [1, 0], sizes = [1, 4], strides = [1, 1]} : vector<8x128xf32> to vector<1x4xf32>
    %16 = vector.extract_strided_slice %13 {offsets = [2, 0], sizes = [1, 8], strides = [1, 1]} : vector<8x128xf32> to vector<1x8xf32>
    %17 = vector.extract_strided_slice %13 {offsets = [3, 0], sizes = [1, 4], strides = [1, 1]} : vector<8x128xf32> to vector<1x4xf32>
    %cst_9 = arith.constant dense<0.000000e+00> : vector<2x32xf32>
    %18 = tpu.matmul %9, %11, %cst_9 {dimension_numbers = #tpu.dot_dimension_numbers<[1], [0], [0], [1], [0, 0, 1, 1], [], []>} : vector<2x32xf32>, vector<32x32xf32>, vector<2x32xf32> -> vector<2x32xf32>
    %19 = vector.broadcast %14 : vector<1x32xf32> to vector<2x32xf32>
    %20 = arith.addf %18, %19 : vector<2x32xf32>
    %21 = math.tanh %20 : vector<2x32xf32>
    %cst_10 = arith.constant dense<0.000000e+00> : vector<2x4xf32>
    %22 = tpu.matmul %21, %12, %cst_10 {dimension_numbers = #tpu.dot_dimension_numbers<[1], [0], [0], [1], [0, 0, 1, 1], [], []>} : vector<2x32xf32>, vector<32x4xf32>, vector<2x4xf32> -> vector<2x4xf32>
    %23 = vector.broadcast %15 : vector<1x4xf32> to vector<2x4xf32>
    %24 = arith.addf %22, %23 : vector<2x4xf32>
    %c0_11 = arith.constant 0 : index
    %c0_12 = arith.constant 0 : index
    %25 = vector.load %arg3[%c0_11, %c0_12] : memref<512x128xf32, #tpu.memory_space<vmem>>, vector<512x128xf32>
    %c0_13 = arith.constant 0 : index
    %c0_14 = arith.constant 0 : index
    %26 = vector.load %arg5[%c0_13, %c0_14] : memref<136x8xf32, #tpu.memory_space<vmem>>, vector<136x8xf32>
    %27 = vector.extract_strided_slice %26 {offsets = [0, 0], sizes = [128, 8], strides = [1, 1]} : vector<136x8xf32> to vector<128x8xf32>
    %28 = vector.extract_strided_slice %26 {offsets = [128, 0], sizes = [8, 4], strides = [1, 1]} : vector<136x8xf32> to vector<8x4xf32>
    %cst_15 = arith.constant dense<0.000000e+00> : vector<512x8xf32>
    %29 = tpu.matmul %25, %27, %cst_15 {dimension_numbers = #tpu.dot_dimension_numbers<[1], [0], [0], [1], [0, 0, 1, 1], [], []>} : vector<512x128xf32>, vector<128x8xf32>, vector<512x8xf32> -> vector<512x8xf32>
    %30 = vector.broadcast %16 : vector<1x8xf32> to vector<512x8xf32>
    %31 = arith.addf %29, %30 : vector<512x8xf32>
    %cst_16 = arith.constant 0.000000e+00 : f32
    %32 = vector.broadcast %cst_16 : f32 to vector<512x8xf32>
    %33 = arith.maximumf %31, %32 : vector<512x8xf32>
    %34 = vector.shape_cast %33 : vector<512x8xf32> to vector<2x256x8xf32>
    %cst_17 = arith.constant dense<0.000000e+00> : vector<2x8xf32>
    %35 = vector.multi_reduction <add>, %34, %cst_17 [1] : vector<2x256x8xf32> to vector<2x8xf32>
    %cst_18 = arith.constant 3.906250e-03 : f32
    %36 = vector.broadcast %cst_18 : f32 to vector<2x8xf32>
    %37 = arith.mulf %35, %36 : vector<2x8xf32>
    %cst_19 = arith.constant dense<0.000000e+00> : vector<2x4xf32>
    %38 = tpu.matmul %37, %28, %cst_19 {dimension_numbers = #tpu.dot_dimension_numbers<[1], [0], [0], [1], [0, 0, 1, 1], [], []>} : vector<2x8xf32>, vector<8x4xf32>, vector<2x4xf32> -> vector<2x4xf32>
    %39 = vector.broadcast %17 : vector<1x4xf32> to vector<2x4xf32>
    %40 = arith.addf %38, %39 : vector<2x4xf32>
    %41 = arith.addf %24, %40 : vector<2x4xf32>
    %cst_20 = arith.constant 5.000000e-01 : f32
    %42 = vector.broadcast %cst_20 : f32 to vector<2x4xf32>
    %43 = arith.mulf %41, %42 : vector<2x4xf32>
    %44 = tpu.concatenate %43, %24, %40 in 1 : vector<2x4xf32>, vector<2x4xf32>, vector<2x4xf32> -> vector<2x12xf32>
    %c0_21 = arith.constant 0 : index
    %c0_22 = arith.constant 0 : index
    %45 = vector.load %arg7[%c0_21, %c0_22] : memref<2x12xf32, #tpu.memory_space<vmem>>, vector<2x12xf32>
    tpu.vector_store %arg7[%c0_21, %c0_22], %44 {strides = array<i32>} : memref<2x12xf32, #tpu.memory_space<vmem>>, vector<2x12xf32>,
    return
  }
  func.func @transform_0(%arg0: i32) -> (i32, i32, i32) {
    %c0_i32 = arith.constant 0 : i32
    %c0_i32_0 = arith.constant 0 : i32
    %c0_i32_1 = arith.constant 0 : i32
    %c0_i32_2 = arith.constant 0 : i32
    return %c0_i32, %c0_i32_0, %c0_i32_1 : i32, i32, i32
  }
  func.func @transform_1(%arg0: i32) -> (i32, i32) {
    %c0_i32 = arith.constant 0 : i32
    %c0_i32_0 = arith.constant 0 : i32
    %c0_i32_1 = arith.constant 0 : i32
    return %c0_i32, %c0_i32_0 : i32, i32
  }
  func.func @transform_2(%arg0: i32) -> (i32, i32) {
    %c0_i32 = arith.constant 0 : i32
    %c0_i32_0 = arith.constant 0 : i32
    %c0_i32_1 = arith.constant 0 : i32
    return %c0_i32, %c0_i32_0 : i32, i32
  }
  func.func @transform_3(%arg0: i32) -> (i32, i32) {
    %c0_i32 = arith.constant 0 : i32
    %c0_i32_0 = arith.constant 0 : i32
    %c0_i32_1 = arith.constant 0 : i32
    return %c0_i32, %c0_i32_0 : i32, i32
  }
  func.func @transform_4(%arg0: i32) -> (i32, i32) {
    %c0_i32 = arith.constant 0 : i32
    %c0_i32_0 = arith.constant 0 : i32
    %c0_i32_1 = arith.constant 0 : i32
    return %c0_i32, %c0_i32_0 : i32, i32
  }
  func.func @transform_5(%arg0: i32) -> (i32, i32) {
    %c0_i32 = arith.constant 0 : i32
    %c0_i32_0 = arith.constant 0 : i32
    %c0_i32_1 = arith.constant 0 : i32
    return %c0_i32, %c0_i32_0 : i32, i32
  }
  func.func @transform_6(%arg0: i32) -> (i32, i32) {
    %c0_i32 = arith.constant 0 : i32
    %c0_i32_0 = arith.constant 0 : i32
    %c0_i32_1 = arith.constant 0 : i32
    return %c0_i32, %c0_i32_0 : i32, i32
  }
}

</mosaic_0001>

<bundles_post_ra>
// kernel: mml_base_vt_forward.1
= control target key start
LH: loop header
LB: loop body
LE: loop exit
PB: predicated region body
PF: predicated region fallthrough
CT: control target
= control target key end

     0   :  { %vm26_vm0 = vcmask 58368   ;;  %v30_v0 = vlaneseq  ;;  %v1354_v11 = vmov 0.0|0.0   ;;  %vm1355_vm1 = vmmov 0   ;;  %s1357_s30 = smov 96   ;;  %s1890_s1 = inlined_call_operand.vmem [shape: f32[2,8], index: 1, kind: input, shape index: {}]   ;;  %s1891_s3 = inlined_call_operand.vmem [shape: f32[32,36], index: 3, kind: input, shape index: {}]   ;;  %s1892_s4 = inlined_call_operand.vmem [shape: f32[136,8], index: 4, kind: input, shape index: {}]   ;;  %s1893_s0 = inlined_call_operand.vmem [shape: f32[2,8,32], index: 0, kind: input, shape index: {}]   ;;  %s1894_s2 = inlined_call_operand.vmem [shape: f32[512,128], index: 2, kind: input, shape index: {}]   ;;  %s1895_s5 = inlined_call_operand.vmem [shape: f32[8,128], index: 5, kind: input, shape index: {}]   ;;  %s1896_s6 = inlined_call_operand.vmem [shape: f32[2,12], index: 6, kind: output, shape index: {}]  }
   0x1   :  { %v25_v1 = vld [vmem:[%s1890_s1] sm:$0x3]  ;;  %v70_v9 = vld [vmem:[%s1891_s3 + $0x8] sm:$0xff]  ;;  %1272 = vmatprep.subr.bf16.mxu0 %v1354_v11  ;;  %1278 = vmatprep.subr.bf16.mxu1 %v1354_v11  ;;  %v71_v12 = vld [vmem:[%s1891_s3 + $0x10] sm:$0xff]  ;;  %v1356_v15 = vmov 0.0   ;;  %vm46_vm2 = vcmask 261120  }
   0x2   :  { %v27_v2 = vsel %vm26_vm0, %v25_v1, 0.0  ;;  %v1398_v3 = vshrl.u32 %v30_v0, 7  ;;  %v69_v8 = vld [vmem:[%s1891_s3] sm:$0xff]  ;;  %v72_v13 = vld [vmem:[%s1891_s3 + $0x18] sm:$0xff]  ;;  %1125 = vmatprep.mubr.msk.f32.mxu0 %vm1355_vm1, %v1356_v15  ;;  %1136 = vmatprep.mubr.msk.f32.mxu1 %vm1355_vm1, %v1356_v15  ;;  %v314_v19 = vld [vmem:[%s1892_s4 + $0x8] sm:$0xff]  ;;  %vm81_vm3 = vcmask 1041409  }
   0x3   :  { %28 = vadd.xlane.f32.xlu0 %v27_v2  ;;  %v1273_v10 = vpack.c.bf16 %v70_v9, %v69_v8  ;;  %v1276_v14 = vpack.c.bf16 %v72_v13, %v71_v12  ;;  %v1338_v16 = vpack.i.bf16 %v70_v9, %v69_v8  ;;  %v1343_v17 = vpack.i.bf16 %v72_v13, %v71_v12  ;;  %v313_v18 = vld [vmem:[%s1892_s4] sm:$0xff]  ;;  %v24_v28 = vld [vmem:[%s1893_s0 + $0x8] sm:$0xff]  ;;  %v315_v46 = vld [vmem:[%s1892_s4 + $0x10] sm:$0xff]  ;;  %s1358_s3 = smov 4  }
   0x4   :  { %v32_v4 = vsub.s32 0, %v1398_v3  ;;  %v39_v6 = vsub.s32 1, %v1398_v3  ;;  %v1431_v20 = vpack.c.bf16 %v314_v19, %v313_v18  ;;  %v23_v22 = vld [vmem:[%s1893_s0] sm:$0xff]  ;;  %v316_v47 = vld [vmem:[%s1892_s4 + $0x18] sm:$0xff]  ;;  %v318_v54 = vld [vmem:[%s1892_s4 + $0x28] sm:$0xff]  ;;  %vm783_vm4 = vcmask 64512  }
   0x5   :  { %1274 = vmatpush3.bf16.msra.mxu0 %v1273_v10  ;;  %v1448_v50 = vpack.c.bf16 %v316_v47, %v315_v46  ;;  %v249_v51 = vld [vmem:[%s1894_s2] sm:$0xff]  ;;  %v319_v56 = vld [vmem:[%s1892_s4 + $0x30] sm:$0xff]  ;;  %v320_v57 = vld [vmem:[%s1892_s4 + $0x38] sm:$0xff]  ;;  %vm1013_vm5 = vcmask 31744   ;;  %vm1016_vm6 = vcmask 91136  }
   0x6   :  { %v33_v5 = vrot.slane %v25_v1, %v32_v4  ;;  %v40_v7 = vrot.slane %v25_v1, %v39_v6  ;;  %1275 = vmatprep.subr.bf16.mxu0 %v1354_v11  ;;  %v317_v53 = vld [vmem:[%s1892_s4 + $0x20] sm:$0xff]  ;;  %v1473_v58 = vpack.c.bf16 %v320_v57, %v319_v56  ;;  %v322_v60 = vld [vmem:[%s1892_s4 + $0x48] sm:$0xff]  ;;  %v323_v62 = vld [vmem:[%s1892_s4 + $0x50] sm:$0xff] }
   0x7   :  { %v1463_v55 = vpack.c.bf16 %v318_v54, %v317_v53  ;;  %v321_v59 = vld [vmem:[%s1892_s4 + $0x40] sm:$0xff]  ;;  %v324_v63 = vld [vmem:[%s1892_s4 + $0x58] sm:$0xff]  ;;  %v326_v2 = vld [vmem:[%s1892_s4 + $0x68] sm:$0xff] }
   0x8   :  { %35 = vbcast.lane.b32.xlu1 %v33_v5, 256  ;;  %v1483_v61 = vpack.c.bf16 %v322_v60, %v321_v59  ;;  %v1493_v0 = vpack.c.bf16 %v324_v63, %v323_v62  ;;  %v325_v1 = vld [vmem:[%s1892_s4 + $0x60] sm:$0xff]  ;;  %v328_v8 = vld [vmem:[%s1892_s4 + $0x78] sm:$0xff]  ;;  %v250_v10 = vld [vmem:[%s1894_s2 + $0x8] sm:$0xff] }
   0x9   :  { %1277 = vmatpush3.bf16.msra.mxu0 %v1276_v14  ;;  %v1503_v5 = vpack.c.bf16 %v326_v2, %v325_v1  ;;  %v251_v12 = vld [vmem:[%s1894_s2 + $0x10] sm:$0xff]  ;;  %v252_v13 = vld [vmem:[%s1894_s2 + $0x18] sm:$0xff]  ;;  %v253_v14 = vld [vmem:[%s1894_s2 + $0x20] sm:$0xff] }
   0xa   :  { %1285 = vmatprep.subr.bf16.mxu0 %v1431_v20  ;;  %v256_v18 = vld [vmem:[%s1894_s2 + $0x38] sm:$0xff]  ;;  %v257_v19 = vld [vmem:[%s1894_s2 + $0x40] sm:$0xff]  ;;  %v282_v53 = vld [vmem:[%s1894_s2 + $0x108] sm:$0xff] }
   0xb   :  { %v276_v46 = vld [vmem:[%s1894_s2 + $0xd8] sm:$0xff]  ;;  %v277_v47 = vld [vmem:[%s1894_s2 + $0xe0] sm:$0xff]  ;;  %v283_v62 = vld [vmem:[%s1894_s2 + $0x110] sm:$0xff] }
   0xc   :  { %1339 = vrot.lane.b32.xlu1 %v1338_v16, %s1357_s30  ;;  %v254_v16 = vld [vmem:[%s1894_s2 + $0x28] sm:$0xff]  ;;  %v1622_v54 = vld [vmem:[%s1895_s5] sm:$0xff] }
   0xd   :  { %v77_v56 = vrot.slane %v1622_v54, %v32_v4  ;;  %v332_v4 = vsub.s32 2, %v1398_v3 }
   0xf   :  { %v1641_v1 = vrot.slane %v1622_v54, %v332_v4 }
  0x10   :  { %1344 = vrot.lane.b32.xlu1 %v1343_v17, %s1357_s30  ;;  %v255_v17 = vld [vmem:[%s1894_s2 + $0x30] sm:$0xff] }
  0x19   :  { %42 = vbcast.lane.b32.xlu0 %v40_v7, 256  ;;  %v327_v7 = vld [vmem:[%s1892_s4 + $0x70] sm:$0xff] }
  0x1a   :  { %v1513_v9 = vpack.c.bf16 %v328_v8, %v327_v7 }
  0x7a   :  { %v36_v21 = vpop.permute.xlu1 %35 }
  0x7b   :  { %v44_v23 = vmul.f32 %v36_v21, %v23_v22  ;;  %v258_v21 = vld [vmem:[%s1894_s2 + $0x48] sm:$0xff]  ;;  %v259_v22 = vld [vmem:[%s1894_s2 + $0x50] sm:$0xff] }
  0x7d   :  { %v47_v24 = vsel %vm46_vm2, %v44_v23, 0.0  ;;  %v260_v23 = vld [vmem:[%s1894_s2 + $0x58] sm:$0xff] }
  0x7e   :  { %v48_v25 = vrot.slane %v47_v24, 4 }
  0x80   :  { %v49_v27 = vadd.f32 %v48_v25, %v47_v24  ;;  %v261_v24 = vld [vmem:[%s1894_s2 + $0x60] sm:$0xff]  ;;  %v262_v25 = vld [vmem:[%s1894_s2 + $0x68] sm:$0xff] }
  0x82   :  { %v50_v32 = vrot.slane %v49_v27, 2 }
  0x84   :  { %v51_v35 = vadd.f32 %v50_v32, %v49_v27  ;;  %v264_v27 = vld [vmem:[%s1894_s2 + $0x78] sm:$0xff] }
  0x86   :  { %v52_v38 = vrot.slane %v51_v35, 1 }
  0x88   :  { %v53_v42 = vadd.f32 %v52_v38, %v51_v35 }
  0x90   :  { %v29_v26 = vpop.xlane.xlu0 %28 }
  0x91   :  { %v62_v30 = vrot.slane %v29_v26, 1  ;;  %1348 = vrcp.f32 %v29_v26  ;;  %v263_v26 = vld [vmem:[%s1894_s2 + $0x70] sm:$0xff] }
  0x93   :  { %1350 = vrcp.f32 %v62_v30  ;;  %v266_v30 = vld [vmem:[%s1894_s2 + $0x88] sm:$0xff] }
  0x94   :  { %v43_v29 = vpop.permute.xlu0 %42 }
  0x95   :  { %v45_v31 = vmul.f32 %v43_v29, %v24_v28  ;;  %v265_v28 = vld [vmem:[%s1894_s2 + $0x80] sm:$0xff]  ;;  %v1340_v29 = vpop.permute.xlu1 %1339 }
  0x96   :  { %v1341_v32 = vunpack.i.l.bf16 %v1340_v29 }
  0x97   :  { %v54_v33 = vsel %vm46_vm2, %v45_v31, 0.0  ;;  %v1342_v31 = vunpack.i.h.bf16 %v1340_v29 }
  0x98   :  { %v55_v34 = vrot.slane %v54_v33, 4 }
  0x99   :  { %v1279_v35 = vpack.c.bf16 %v1342_v31, %v1341_v32 }
  0x9a   :  { %v56_v36 = vadd.f32 %v55_v34, %v54_v33  ;;  %v267_v33 = vld [vmem:[%s1894_s2 + $0x90] sm:$0xff]  ;;  %v268_v34 = vld [vmem:[%s1894_s2 + $0x98] sm:$0xff] }
  0x9b   :  { %v1349_v41 = vpop.eup %1348  ;;  %1280 = vmatpush3.bf16.msra.mxu1 %v1279_v35  ;;  %v286_v35 = vld [vmem:[%s1894_s2 + $0x128] sm:$0xff] }
  0x9c   :  { %v57_v37 = vrot.slane %v56_v36, 2  ;;  %v66_v48 = vmul.f32 %v1349_v41, %v53_v42  ;;  %1281 = vmatprep.subr.bf16.mxu1 %v1354_v11  ;;  %v271_v42 = vld [vmem:[%s1894_s2 + $0xb0] sm:$0xff]  ;;  %v273_v11 = vld [vmem:[%s1894_s2 + $0xc0] sm:$0xff] }
  0x9d   :  { %v1351_v44 = vpop.eup %1350 }
  0x9e   :  { %v58_v39 = vadd.f32 %v57_v37, %v56_v36  ;;  %v269_v36 = vld [vmem:[%s1894_s2 + $0xa0] sm:$0xff]  ;;  %v1345_v37 = vpop.permute.xlu1 %1344 }
  0x9f   :  { %v1347_v38 = vunpack.i.h.bf16 %v1345_v37 }
  0xa0   :  { %v59_v40 = vrot.slane %v58_v39, 1 }
  0xa2   :  { %v60_v43 = vadd.f32 %v59_v40, %v58_v39  ;;  %v1346_v39 = vunpack.i.l.bf16 %v1345_v37  ;;  %v270_v40 = vld [vmem:[%s1894_s2 + $0xa8] sm:$0xff] }
  0xa4   :  { %v68_v45 = vmul.f32 %v1351_v44, %v60_v43  ;;  %v1282_v41 = vpack.c.bf16 %v1347_v38, %v1346_v39  ;;  %v272_v43 = vld [vmem:[%s1894_s2 + $0xb8] sm:$0xff]  ;;  %v274_v44 = vld [vmem:[%s1894_s2 + $0xc8] sm:$0xff]  ;;  %v287_v38 = vld [vmem:[%s1894_s2 + $0x130] sm:$0xff] }
  0xa6   :  { %v80_v49 = vrot.slane %v68_v45, 7  ;;  %1283 = vmatpush3.bf16.msra.mxu1 %v1282_v41  ;;  %v275_v45 = vld [vmem:[%s1894_s2 + $0xd0] sm:$0xff] }
  0xa7   :  { %1316 = vmatprep.subr.bf16.mxu1 %v1431_v20 }
  0xa8   :  { %v82_v52 = vsel %vm81_vm3, %v80_v49, %v66_v48  ;;  %v278_v48 = vld [vmem:[%s1894_s2 + $0xe8] sm:$0xff]  ;;  %v279_v49 = vld [vmem:[%s1894_s2 + $0xf0] sm:$0xff] }
  0xa9   :  { %1126 = vmatmul.mubr.msk.f32.vlgmr.msra.gmra.mrb[0].mxu0 %vm46_vm2, %v82_v52  ;;  %v281_v52 = vld [vmem:[%s1894_s2 + $0x100] sm:$0xff] }
  0xaa   :  { %1287 = vmatpush3.bf16.msra.mxu0 %v1431_v20  ;;  %1171 = vmatprep.mubr.f32.mxu0 %v249_v51  ;;  %v280_v51 = vld [vmem:[%s1894_s2 + $0xf8] sm:$0xff] }
  0xab   :  { %1289 = vmatprep.subr.bf16.mxu0 %v1448_v50 }
  0xae   :  { %1291 = vmatpush3.bf16.msra.mxu0 %v1448_v50 }
  0xaf   :  { %1293 = vmatprep.subr.bf16.mxu0 %v1463_v55 }
  0xb2   :  { %1295 = vmatpush3.bf16.msra.mxu0 %v1463_v55 }
  0xb3   :  { %1297 = vmatprep.subr.bf16.mxu0 %v1473_v58 }
  0xb6   :  { %1299 = vmatpush3.bf16.msra.mxu0 %v1473_v58 }
  0xb7   :  { %1301 = vmatprep.subr.bf16.mxu0 %v1483_v61 }
  0xba   :  { %1303 = vmatpush3.bf16.msra.mxu0 %v1483_v61 }
  0xbb   :  { %1305 = vmatprep.subr.bf16.mxu0 %v1493_v0 }
  0xbe   :  { %1307 = vmatpush3.bf16.msra.mxu0 %v1493_v0 }
  0xbf   :  { %1309 = vmatprep.subr.bf16.mxu0 %v1503_v5 }
  0xc2   :  { %1311 = vmatpush3.bf16.msra.mxu0 %v1503_v5 }
  0xc3   :  { %1313 = vmatprep.subr.bf16.mxu0 %v1513_v9 }
  0xc6   :  { %1315 = vmatpush3.bf16.msra.mxu0 %v1513_v9 }
  0xc9   :  { %1172 = vmatmul.mubr.f32.vlgmr.msra.gmra.mrb[2].mxu0 %v250_v10 }
  0xca   :  { %1174 = vmatprep.mubr.f32.mxu0 %v251_v12 }
  0xcd   :  { %1175 = vmatmul.mubr.f32.gmra.mrb[4].mxu0 %v252_v13 }
  0xce   :  { %1177 = vmatprep.mubr.f32.mxu0 %v253_v14 }
  0xd1   :  { %1178 = vmatmul.mubr.f32.gmra.mrb[6].mxu0 %v254_v16 }
  0xd2   :  { %1180 = vmatprep.mubr.f32.mxu0 %v255_v17 }
  0xd5   :  { %1181 = vmatmul.mubr.f32.gmra.mrb[8].mxu0 %v256_v18 }
  0xd6   :  { %1183 = vmatprep.mubr.f32.mxu0 %v257_v19 }
  0xd9   :  { %1184 = vmatmul.mubr.f32.gmra.mrb[10].mxu0 %v258_v21 }
  0xda   :  { %1186 = vmatprep.mubr.f32.mxu0 %v259_v22 }
  0xdd   :  { %1187 = vmatmul.mubr.f32.gmra.mrb[12].mxu0 %v260_v23 }
  0xde   :  { %1189 = vmatprep.mubr.f32.mxu0 %v261_v24 }
  0xe1   :  { %1190 = vmatmul.mubr.f32.gmra.mrb[14].mxu0 %v262_v25 }
  0xe2   :  { %1192 = vmatprep.mubr.f32.mxu0 %v263_v26 }
  0xe5   :  { %1193 = vmatmul.mubr.f32.gmra.mrb[16].mxu0 %v264_v27  ;;  %v285_v27 = vld [vmem:[%s1894_s2 + $0x120] sm:$0xff] }
  0xe6   :  { %1195 = vmatprep.mubr.f32.mxu0 %v265_v28 }
  0xe9   :  { %1196 = vmatmul.mubr.f32.gmra.mrb[18].mxu0 %v266_v30 }
  0xea   :  { %1198 = vmatprep.mubr.f32.mxu0 %v267_v33 }
  0xed   :  { %1199 = vmatmul.mubr.f32.gmra.mrb[20].mxu0 %v268_v34 }
  0xee   :  { %1201 = vmatprep.mubr.f32.mxu0 %v269_v36 }
  0xf1   :  { %1202 = vmatmul.mubr.f32.gmra.mrb[22].mxu0 %v270_v40 }
  0xf2   :  { %1204 = vmatprep.mubr.f32.mxu0 %v271_v42 }
  0xf5   :  { %1205 = vmatmul.mubr.f32.gmra.mrb[24].mxu0 %v272_v43 }
  0xf6   :  { %1207 = vmatprep.mubr.f32.mxu0 %v273_v11 }
  0xf9   :  { %1208 = vmatmul.mubr.f32.gmra.mrb[26].mxu0 %v274_v44 }
  0xfa   :  { %1210 = vmatprep.mubr.f32.mxu0 %v275_v45 }
  0xfd   :  { %1211 = vmatmul.mubr.f32.gmra.mrb[28].mxu0 %v276_v46  ;;  %v288_v46 = vld [vmem:[%s1894_s2 + $0x138] sm:$0xff] }
  0xfe   :  { %1213 = vmatprep.mubr.f32.mxu0 %v277_v47 }
 0x101   :  { %1214 = vmatmul.mubr.f32.gmra.mrb[30].mxu0 %v278_v48 }
 0x102   :  { %1216 = vmatprep.mubr.f32.mxu0 %v279_v49  ;;  %v289_v49 = vld [vmem:[%s1894_s2 + $0x140] sm:$0xff] }
 0x105   :  { %1217 = vmatmul.mubr.f32.gmra.mrb[32].mxu0 %v280_v51 }
 0x106   :  { %1219 = vmatprep.mubr.f32.mxu0 %v281_v52 }
 0x109   :  { %1220 = vmatmul.mubr.f32.gmra.mrb[34].mxu0 %v282_v53 }
 0x17c   :  { %v151_v57 = vpop.f32.mrb[0].mxu0 }
 0x17d   :  { %v152_v59 = vadd.f32 %v151_v57, %v77_v56  ;;  %v1127_v60 = vpop.f32.mrb[1].mxu0 }
 0x17f   :  { %1352 = vtanh.f32 %v152_v59 }
 0x189   :  { %v1353_v63 = vpop.eup %1352 }
 0x18a   :  { %1137 = vmatmul.mubr.msk.f32.vlgmr.msra.gmra.mrb[0].mxu1 %vm46_vm2, %v1353_v63  ;;  %v290_v63 = vld [vmem:[%s1894_s2 + $0x148] sm:$0xff] }
 0x18b   :  { %1324 = vmatpush3.bf16.msra.mxu1 %v1431_v20  ;;  %1222 = vmatprep.mubr.f32.mxu1 %v283_v62 }
 0x18c   :  { %1317 = vmatprep.subr.bf16.mxu1 %v1448_v50 }
 0x18f   :  { %1325 = vmatpush3.bf16.msra.mxu1 %v1448_v50 }
 0x190   :  { %1318 = vmatprep.subr.bf16.mxu1 %v1463_v55 }
 0x193   :  { %1326 = vmatpush3.bf16.msra.mxu1 %v1463_v55 }
 0x194   :  { %1319 = vmatprep.subr.bf16.mxu1 %v1473_v58 }
 0x197   :  { %1327 = vmatpush3.bf16.msra.mxu1 %v1473_v58 }
 0x198   :  { %1320 = vmatprep.subr.bf16.mxu1 %v1483_v61 }
 0x19b   :  { %1328 = vmatpush3.bf16.msra.mxu1 %v1483_v61 }
 0x19c   :  { %1321 = vmatprep.subr.bf16.mxu1 %v1493_v0  ;;  %v1173_v20 = vpop.f32.mrb[2].mxu0 }
 0x19d   :  { %v406_v50 = vadd.f32 %v1173_v20, %v1641_v1  ;;  %v400_v2 = vpop.f32.mrb[3].mxu0 }
 0x19e   :  { %v401_v55 = vadd.f32 %v400_v2, %v1641_v1 }
 0x19f   :  { %1329 = vmatpush3.bf16.msra.mxu1 %v1493_v0  ;;  %v720_v7 = vmax.f32 %v406_v50, 0.0  ;;  %v291_v50 = vld [vmem:[%s1894_s2 + $0x150] sm:$0xff] }
 0x1a0   :  { %1322 = vmatprep.subr.bf16.mxu1 %v1503_v5  ;;  %v719_v58 = vmax.f32 %v401_v55, 0.0  ;;  %v1176_v8 = vpop.f32.mrb[4].mxu0 }
 0x1a1   :  { %v785_v10 = vsel %vm783_vm4, %v720_v7, 0.0  ;;  %v416_v61 = vadd.f32 %v1176_v8, %v1641_v1  ;;  %v410_v12 = vpop.f32.mrb[5].mxu0 }
 0x1a2   :  { %v784_v13 = vsel %vm783_vm4, %v719_v58, 0.0  ;;  %v411_v14 = vadd.f32 %v410_v12, %v1641_v1 }
 0x1a3   :  { %1330 = vmatpush3.bf16.msra.mxu1 %v1503_v5  ;;  %v786_v16 = vadd.f32 %v785_v10, %v784_v13  ;;  %v722_v17 = vmax.f32 %v416_v61, 0.0  ;;  %v284_v5 = vld [vmem:[%s1894_s2 + $0x118] sm:$0xff] }
 0x1a4   :  { %1323 = vmatprep.subr.bf16.mxu1 %v1513_v9  ;;  %v721_v0 = vmax.f32 %v411_v14, 0.0  ;;  %v1179_v18 = vpop.f32.mrb[6].mxu0  ;;  %v292_v13 = vld [vmem:[%s1894_s2 + $0x158] sm:$0xff] }
 0x1a5   :  { %v426_v19 = vadd.f32 %v1179_v18, %v1641_v1  ;;  %v420_v21 = vpop.f32.mrb[7].mxu0  ;;  %v789_v22 = vsel %vm783_vm4, %v722_v17, 0.0  ;;  %v293_v17 = vld [vmem:[%s1894_s2 + $0x160] sm:$0xff] }
 0x1a6   :  { %v787_v23 = vsel %vm783_vm4, %v721_v0, 0.0  ;;  %v421_v24 = vadd.f32 %v420_v21, %v1641_v1 }
 0x1a7   :  { %1331 = vmatpush3.bf16.msra.mxu1 %v1513_v9  ;;  %v788_v25 = vadd.f32 %v787_v23, %v786_v16  ;;  %v724_v26 = vmax.f32 %v426_v19, 0.0 }
 0x1a8   :  { %v723_v28 = vmax.f32 %v421_v24, 0.0  ;;  %v1182_v29 = vpop.f32.mrb[8].mxu0  ;;  %1267 = vmatprep.subr.mxu1 %v1356_v15 }
 0x1a9   :  { %v790_v30 = vadd.f32 %v789_v22, %v788_v25  ;;  %v436_v31 = vadd.f32 %v1182_v29, %v1641_v1  ;;  %v430_v32 = vpop.f32.mrb[9].mxu0  ;;  %v793_v9 = vsel %vm783_vm4, %v724_v26, 0.0  ;;  %v294_v25 = vld [vmem:[%s1894_s2 + $0x168] sm:$0xff] }
 0x1aa   :  { %1223 = vmatmul.mubr.f32.vlgmr.msra.gmra.mrb[2].mxu1 %v284_v5  ;;  %v791_v33 = vsel %vm783_vm4, %v723_v28, 0.0  ;;  %v431_v34 = vadd.f32 %v430_v32, %v1641_v1  ;;  %v295_v28 = vld [vmem:[%s1894_s2 + $0x170] sm:$0xff] }
 0x1ab   :  { %1225 = vmatprep.mubr.f32.mxu1 %v285_v27  ;;  %v792_v36 = vadd.f32 %v791_v33, %v790_v30  ;;  %v726_v37 = vmax.f32 %v436_v31, 0.0 }
 0x1ac   :  { %v725_v39 = vmax.f32 %v431_v34, 0.0  ;;  %v1185_v40 = vpop.f32.mrb[10].mxu0  ;;  %v297_v34 = vld [vmem:[%s1894_s2 + $0x180] sm:$0xff] }
 0x1ad   :  { %v794_v41 = vadd.f32 %v793_v9, %v792_v36  ;;  %v446_v42 = vadd.f32 %v1185_v40, %v1641_v1  ;;  %v440_v43 = vpop.f32.mrb[11].mxu0  ;;  %v797_v11 = vsel %vm783_vm4, %v726_v37, 0.0  ;;  %v296_v9 = vld [vmem:[%s1894_s2 + $0x178] sm:$0xff]  ;;  %v298_v36 = vld [vmem:[%s1894_s2 + $0x188] sm:$0xff]  ;;  %v299_v37 = vld [vmem:[%s1894_s2 + $0x190] sm:$0xff] }
 0x1ae   :  { %1226 = vmatmul.mubr.f32.gmra.mrb[4].mxu1 %v286_v35  ;;  %v795_v44 = vsel %vm783_vm4, %v725_v39, 0.0  ;;  %v441_v45 = vadd.f32 %v440_v43, %v1641_v1  ;;  %v301_v39 = vld [vmem:[%s1894_s2 + $0x1a0] sm:$0xff]  ;;  %v302_v40 = vld [vmem:[%s1894_s2 + $0x1a8] sm:$0xff] }
 0x1af   :  { %1228 = vmatprep.mubr.f32.mxu1 %v287_v38  ;;  %v796_v47 = vadd.f32 %v795_v44, %v794_v41  ;;  %v728_v48 = vmax.f32 %v446_v42, 0.0  ;;  %v300_v38 = vld [vmem:[%s1894_s2 + $0x198] sm:$0xff]  ;;  %v303_v41 = vld [vmem:[%s1894_s2 + $0x1b0] sm:$0xff]  ;;  %v305_v43 = vld [vmem:[%s1894_s2 + $0x1c0] sm:$0xff] }
 0x1b0   :  { %v727_v51 = vmax.f32 %v441_v45, 0.0  ;;  %v1188_v52 = vpop.f32.mrb[12].mxu0  ;;  %v304_v42 = vld [vmem:[%s1894_s2 + $0x1b8] sm:$0xff] }
 0x1b1   :  { %v798_v53 = vadd.f32 %v797_v11, %v796_v47  ;;  %v456_v56 = vadd.f32 %v1188_v52, %v1641_v1  ;;  %v450_v57 = vpop.f32.mrb[13].mxu0  ;;  %v801_v59 = vsel %vm783_vm4, %v728_v48, 0.0  ;;  %v307_v48 = vld [vmem:[%s1894_s2 + $0x1d0] sm:$0xff] }
 0x1b2   :  { %1229 = vmatmul.mubr.f32.gmra.mrb[6].mxu1 %v288_v46  ;;  %v799_v60 = vsel %vm783_vm4, %v727_v51, 0.0  ;;  %v451_v62 = vadd.f32 %v450_v57, %v1641_v1  ;;  %v306_v46 = vld [vmem:[%s1894_s2 + $0x1c8] sm:$0xff]  ;;  %v308_v57 = vld [vmem:[%s1894_s2 + $0x1d8] sm:$0xff] }
 0x1b3   :  { %1231 = vmatprep.mubr.f32.mxu1 %v289_v49  ;;  %v800_v4 = vadd.f32 %v799_v60, %v798_v53  ;;  %v730_v20 = vmax.f32 %v456_v56, 0.0 }
 0x1b4   :  { %v729_v2 = vmax.f32 %v451_v62, 0.0  ;;  %v1191_v55 = vpop.f32.mrb[14].mxu0 }
 0x1b5   :  { %v802_v7 = vadd.f32 %v801_v59, %v800_v4  ;;  %v466_v58 = vadd.f32 %v1191_v55, %v1641_v1  ;;  %v460_v8 = vpop.f32.mrb[15].mxu0  ;;  %v805_v10 = vsel %vm783_vm4, %v730_v20, 0.0 }
 0x1b6   :  { %1232 = vmatmul.mubr.f32.gmra.mrb[8].mxu1 %v290_v63  ;;  %v803_v61 = vsel %vm783_vm4, %v729_v2, 0.0  ;;  %v461_v12 = vadd.f32 %v460_v8, %v1641_v1  ;;  %v309_v63 = vld [vmem:[%s1894_s2 + $0x1e0] sm:$0xff]  ;;  %v310_v8 = vld [vmem:[%s1894_s2 + $0x1e8] sm:$0xff] }
 0x1b7   :  { %1234 = vmatprep.mubr.f32.mxu1 %v291_v50  ;;  %v804_v14 = vadd.f32 %v803_v61, %v802_v7  ;;  %v732_v16 = vmax.f32 %v466_v58, 0.0 }
 0x1b8   :  { %v731_v0 = vmax.f32 %v461_v12, 0.0  ;;  %v1194_v18 = vpop.f32.mrb[16].mxu0 }
 0x1b9   :  { %v806_v19 = vadd.f32 %v805_v10, %v804_v14  ;;  %v476_v21 = vadd.f32 %v1194_v18, %v1641_v1  ;;  %v470_v22 = vpop.f32.mrb[17].mxu0  ;;  %v809_v23 = vsel %vm783_vm4, %v732_v16, 0.0 }
 0x1ba   :  { %1235 = vmatmul.mubr.f32.gmra.mrb[10].mxu1 %v292_v13  ;;  %v807_v24 = vsel %vm783_vm4, %v731_v0, 0.0  ;;  %v471_v5 = vadd.f32 %v470_v22, %v1641_v1  ;;  %v311_v13 = vld [vmem:[%s1894_s2 + $0x1f0] sm:$0xff] }
 0x1bb   :  { %1237 = vmatprep.mubr.f32.mxu1 %v293_v17  ;;  %v808_v26 = vadd.f32 %v807_v24, %v806_v19  ;;  %v734_v27 = vmax.f32 %v476_v21, 0.0  ;;  %v312_v19 = vld [vmem:[%s1894_s2 + $0x1f8] sm:$0xff] }
 0x1bc   :  { %v733_v29 = vmax.f32 %v471_v5, 0.0  ;;  %v1197_v11 = vpop.f32.mrb[18].mxu0 }
 0x1bd   :  { %v810_v30 = vadd.f32 %v809_v23, %v808_v26  ;;  %v813_v31 = vsel %vm783_vm4, %v734_v27, 0.0  ;;  %v486_v44 = vadd.f32 %v1197_v11, %v1641_v1  ;;  %v480_v45 = vpop.f32.mrb[19].mxu0 }
 0x1be   :  { %1238 = vmatmul.mubr.f32.gmra.mrb[12].mxu1 %v294_v25  ;;  %v811_v32 = vsel %vm783_vm4, %v733_v29, 0.0  ;;  %v481_v47 = vadd.f32 %v480_v45, %v1641_v1 }
 0x1bf   :  { %1240 = vmatprep.mubr.f32.mxu1 %v295_v28  ;;  %v812_v33 = vadd.f32 %v811_v32, %v810_v30  ;;  %v736_v49 = vmax.f32 %v486_v44, 0.0 }
 0x1c0   :  { %v735_v51 = vmax.f32 %v481_v47, 0.0  ;;  %v1200_v52 = vpop.f32.mrb[20].mxu0 }
 0x1c1   :  { %v814_v35 = vadd.f32 %v813_v31, %v812_v33  ;;  %v496_v53 = vadd.f32 %v1200_v52, %v1641_v1  ;;  %v490_v56 = vpop.f32.mrb[21].mxu0  ;;  %v817_v59 = vsel %vm783_vm4, %v736_v49, 0.0 }
 0x1c2   :  { %1241 = vmatmul.mubr.f32.gmra.mrb[14].mxu1 %v296_v9  ;;  %v815_v60 = vsel %vm783_vm4, %v735_v51, 0.0  ;;  %v491_v62 = vadd.f32 %v490_v56, %v1641_v1 }
 0x1c3   :  { %1243 = vmatprep.mubr.f32.mxu1 %v297_v34  ;;  %v816_v4 = vadd.f32 %v815_v60, %v814_v35  ;;  %v738_v20 = vmax.f32 %v496_v53, 0.0 }
 0x1c4   :  { %v737_v50 = vmax.f32 %v491_v62, 0.0  ;;  %v1203_v2 = vpop.f32.mrb[22].mxu0 }
 0x1c5   :  { %v818_v55 = vadd.f32 %v817_v59, %v816_v4  ;;  %v506_v7 = vadd.f32 %v1203_v2, %v1641_v1  ;;  %v500_v58 = vpop.f32.mrb[23].mxu0  ;;  %v821_v10 = vsel %vm783_vm4, %v738_v20, 0.0 }
 0x1c6   :  { %1244 = vmatmul.mubr.f32.gmra.mrb[16].mxu1 %v298_v36  ;;  %v819_v61 = vsel %vm783_vm4, %v737_v50, 0.0  ;;  %v501_v12 = vadd.f32 %v500_v58, %v1641_v1 }
 0x1c7   :  { %1246 = vmatprep.mubr.f32.mxu1 %v299_v37  ;;  %v820_v14 = vadd.f32 %v819_v61, %v818_v55  ;;  %v740_v16 = vmax.f32 %v506_v7, 0.0 }
 0x1c8   :  { %v739_v17 = vmax.f32 %v501_v12, 0.0  ;;  %v1206_v18 = vpop.f32.mrb[24].mxu0 }
 0x1c9   :  { %v822_v0 = vadd.f32 %v821_v10, %v820_v14  ;;  %v825_v21 = vsel %vm783_vm4, %v740_v16, 0.0  ;;  %v516_v23 = vadd.f32 %v1206_v18, %v1641_v1  ;;  %v510_v24 = vpop.f32.mrb[25].mxu0 }
 0x1ca   :  { %1247 = vmatmul.mubr.f32.gmra.mrb[18].mxu1 %v300_v38  ;;  %v823_v22 = vsel %vm783_vm4, %v739_v17, 0.0  ;;  %v511_v25 = vadd.f32 %v510_v24, %v1641_v1  ;;  %v159_v24 = vrot.slane %v1622_v54, %v39_v6 }
 0x1cb   :  { %1249 = vmatprep.mubr.f32.mxu1 %v301_v39  ;;  %v824_v5 = vadd.f32 %v823_v22, %v822_v0  ;;  %v742_v26 = vmax.f32 %v516_v23, 0.0  ;;  %v329_v23 = vld [vmem:[%s1892_s4 + $0x80] sm:$0xff]  ;;  %s1359_s4 = smov 8  }
 0x1cc   :  { %v741_v27 = vmax.f32 %v511_v25, 0.0  ;;  %v1209_v29 = vpop.f32.mrb[26].mxu0  ;;  %1268 = vmatpush3.msra.mxu1 %v329_v23 }
 0x1cd   :  { %v826_v28 = vadd.f32 %v825_v21, %v824_v5  ;;  %v526_v30 = vadd.f32 %v1209_v29, %v1641_v1  ;;  %v520_v31 = vpop.f32.mrb[27].mxu0  ;;  %v829_v32 = vsel %vm783_vm4, %v742_v26, 0.0 }
 0x1ce   :  { %1250 = vmatmul.mubr.f32.gmra.mrb[20].mxu1 %v302_v40  ;;  %v827_v9 = vsel %vm783_vm4, %v741_v27, 0.0  ;;  %v521_v33 = vadd.f32 %v520_v31, %v1641_v1 }
 0x1cf   :  { %1252 = vmatprep.mubr.f32.mxu1 %v303_v41  ;;  %v828_v34 = vadd.f32 %v827_v9, %v826_v28  ;;  %v744_v35 = vmax.f32 %v526_v30, 0.0 }
 0x1d0   :  { %v743_v36 = vmax.f32 %v521_v33, 0.0  ;;  %v1212_v37 = vpop.f32.mrb[28].mxu0 }
 0x1d1   :  { %v830_v38 = vadd.f32 %v829_v32, %v828_v34  ;;  %v536_v39 = vadd.f32 %v1212_v37, %v1641_v1  ;;  %v530_v40 = vpop.f32.mrb[29].mxu0  ;;  %v833_v41 = vsel %vm783_vm4, %v744_v35, 0.0 }
 0x1d2   :  { %1253 = vmatmul.mubr.f32.gmra.mrb[22].mxu1 %v304_v42  ;;  %v831_v42 = vsel %vm783_vm4, %v743_v36, 0.0 }
 0x1d3   :  { %1255 = vmatprep.mubr.f32.mxu1 %v305_v43  ;;  %v832_v43 = vadd.f32 %v831_v42, %v830_v38  ;;  %v746_v11 = vmax.f32 %v536_v39, 0.0 }
 0x1d4   :  { %v1215_v45 = vpop.f32.mrb[30].mxu0 }
 0x1d5   :  { %v546_v47 = vadd.f32 %v1215_v45, %v1641_v1  ;;  %v837_v49 = vsel %vm783_vm4, %v746_v11, 0.0 }
 0x1d6   :  { %1256 = vmatmul.mubr.f32.gmra.mrb[24].mxu1 %v306_v46  ;;  %v834_v46 = vadd.f32 %v833_v41, %v832_v43 }
 0x1d7   :  { %1258 = vmatprep.mubr.f32.mxu1 %v307_v48  ;;  %v540_v48 = vpop.f32.mrb[31].mxu0  ;;  %v748_v56 = vmax.f32 %v546_v47, 0.0 }
 0x1d8   :  { %v541_v52 = vadd.f32 %v540_v48, %v1641_v1  ;;  %v1218_v59 = vpop.f32.mrb[32].mxu0 }
 0x1d9   :  { %v556_v62 = vadd.f32 %v1218_v59, %v1641_v1  ;;  %v841_v4 = vsel %vm783_vm4, %v748_v56, 0.0 }
 0x1da   :  { %1259 = vmatmul.mubr.f32.gmra.mrb[26].mxu1 %v308_v57  ;;  %v747_v57 = vmax.f32 %v541_v52, 0.0 }
 0x1db   :  { %1261 = vmatprep.mubr.f32.mxu1 %v309_v63  ;;  %v550_v63 = vpop.f32.mrb[33].mxu0  ;;  %v750_v55 = vmax.f32 %v556_v62, 0.0 }
 0x1dc   :  { %v839_v20 = vsel %vm783_vm4, %v747_v57, 0.0  ;;  %v551_v50 = vadd.f32 %v550_v63, %v1641_v1 }
 0x1de   :  { %1262 = vmatmul.mubr.f32.gmra.mrb[28].mxu1 %v310_v8  ;;  %v749_v7 = vmax.f32 %v551_v50, 0.0  ;;  %v845_v8 = vsel %vm783_vm4, %v750_v55, 0.0 }
 0x1df   :  { %1264 = vmatprep.mubr.f32.mxu1 %v311_v13  ;;  %v1221_v13 = vpop.f32.mrb[34].mxu0 }
 0x1e0   :  { %v843_v10 = vsel %vm783_vm4, %v749_v7, 0.0  ;;  %v566_v14 = vadd.f32 %v1221_v13, %v1641_v1  ;;  %v560_v16 = vpop.f32.mrb[35].mxu0 }
 0x1e1   :  { %v561_v17 = vadd.f32 %v560_v16, %v1641_v1 }
 0x1e2   :  { %1265 = vmatmul.mubr.f32.gmra.mrb[30].mxu1 %v312_v19  ;;  %v752_v0 = vmax.f32 %v566_v14, 0.0 }
 0x1e3   :  { %1269 = vmatprep.mubr.msk.f32.mxu1 %vm1355_vm1, %v1356_v15  ;;  %v531_v15 = vadd.f32 %v530_v40, %v1641_v1  ;;  %v751_v18 = vmax.f32 %v561_v17, 0.0 }
 0x1e4   :  { %v854_v19 = vsel %vm783_vm4, %v752_v0, 0.0 }
 0x1e5   :  { %v745_v44 = vmax.f32 %v531_v15, 0.0  ;;  %v853_v21 = vsel %vm783_vm4, %v751_v18, 0.0 }
 0x1e6   :  { %v855_v22 = vadd.f32 %v854_v19, %v853_v21 }
 0x1e7   :  { %v835_v51 = vsel %vm783_vm4, %v745_v44, 0.0 }
 0x1e8   :  { %v836_v53 = vadd.f32 %v835_v51, %v834_v46 }
 0x1ea   :  { %v838_v60 = vadd.f32 %v837_v49, %v836_v53 }
 0x1ec   :  { %v840_v2 = vadd.f32 %v839_v20, %v838_v60 }
 0x1ee   :  { %v842_v58 = vadd.f32 %v841_v4, %v840_v2 }
 0x1f0   :  { %v844_v61 = vadd.f32 %v843_v10, %v842_v58 }
 0x1f2   :  { %v1804_v12 = vadd.f32 %v845_v8, %v844_v61 }
 0x25d   :  { %v245_v5 = vpop.f32.mrb[0].mxu1 }
 0x25e   :  { %v1816_v25 = vadd.f32 %v245_v5, %v159_v24  ;;  %v1138_v26 = vpop.f32.mrb[1].mxu1 }
 0x260   :  { %1006 = vrot.lane.b32.xlu1 %v1816_v25, %s1358_s3 }
 0x27d   :  { %v1224_v27 = vpop.f32.mrb[2].mxu1 }
 0x27e   :  { %v576_v28 = vadd.f32 %v1224_v27, %v1641_v1  ;;  %v570_v29 = vpop.f32.mrb[3].mxu1 }
 0x27f   :  { %v571_v30 = vadd.f32 %v570_v29, %v1641_v1 }
 0x280   :  { %v754_v31 = vmax.f32 %v576_v28, 0.0 }
 0x281   :  { %v753_v32 = vmax.f32 %v571_v30, 0.0  ;;  %v1227_v9 = vpop.f32.mrb[4].mxu1 }
 0x282   :  { %v586_v33 = vadd.f32 %v1227_v9, %v1641_v1  ;;  %v580_v34 = vpop.f32.mrb[5].mxu1  ;;  %v858_v37 = vsel %vm783_vm4, %v754_v31, 0.0 }
 0x283   :  { %v856_v6 = vsel %vm783_vm4, %v753_v32, 0.0  ;;  %v581_v35 = vadd.f32 %v580_v34, %v1641_v1 }
 0x284   :  { %v857_v36 = vadd.f32 %v856_v6, %v855_v22  ;;  %v756_v38 = vmax.f32 %v586_v33, 0.0 }
 0x285   :  { %v755_v39 = vmax.f32 %v581_v35, 0.0  ;;  %v1230_v40 = vpop.f32.mrb[6].mxu1 }
 0x286   :  { %v859_v41 = vadd.f32 %v858_v37, %v857_v36  ;;  %v596_v42 = vadd.f32 %v1230_v40, %v1641_v1  ;;  %v590_v15 = vpop.f32.mrb[7].mxu1  ;;  %v862_v45 = vsel %vm783_vm4, %v756_v38, 0.0 }
 0x287   :  { %v860_v43 = vsel %vm783_vm4, %v755_v39, 0.0  ;;  %v591_v11 = vadd.f32 %v590_v15, %v1641_v1 }
 0x288   :  { %v861_v44 = vadd.f32 %v860_v43, %v859_v41  ;;  %v758_v46 = vmax.f32 %v596_v42, 0.0 }
 0x289   :  { %v757_v47 = vmax.f32 %v591_v11, 0.0  ;;  %v1233_v48 = vpop.f32.mrb[8].mxu1 }
 0x28a   :  { %v863_v49 = vadd.f32 %v862_v45, %v861_v44  ;;  %v606_v51 = vadd.f32 %v1233_v48, %v1641_v1  ;;  %v600_v52 = vpop.f32.mrb[9].mxu1  ;;  %v866_v59 = vsel %vm783_vm4, %v758_v46, 0.0 }
 0x28b   :  { %v864_v53 = vsel %vm783_vm4, %v757_v47, 0.0  ;;  %v601_v56 = vadd.f32 %v600_v52, %v1641_v1 }
 0x28c   :  { %v865_v57 = vadd.f32 %v864_v53, %v863_v49  ;;  %v760_v60 = vmax.f32 %v606_v51, 0.0 }
 0x28d   :  { %v759_v62 = vmax.f32 %v601_v56, 0.0  ;;  %v1236_v63 = vpop.f32.mrb[10].mxu1 }
 0x28e   :  { %v867_v4 = vadd.f32 %v866_v59, %v865_v57  ;;  %v616_v20 = vadd.f32 %v1236_v63, %v1641_v1  ;;  %v610_v50 = vpop.f32.mrb[11].mxu1  ;;  %v870_v58 = vsel %vm783_vm4, %v760_v60, 0.0 }
 0x28f   :  { %v868_v2 = vsel %vm783_vm4, %v759_v62, 0.0  ;;  %v611_v55 = vadd.f32 %v610_v50, %v1641_v1 }
 0x290   :  { %v869_v7 = vadd.f32 %v868_v2, %v867_v4  ;;  %v762_v8 = vmax.f32 %v616_v20, 0.0 }
 0x291   :  { %v761_v10 = vmax.f32 %v611_v55, 0.0  ;;  %v1239_v61 = vpop.f32.mrb[12].mxu1 }
 0x292   :  { %v871_v13 = vadd.f32 %v870_v58, %v869_v7  ;;  %v626_v14 = vadd.f32 %v1239_v61, %v1641_v1  ;;  %v620_v16 = vpop.f32.mrb[13].mxu1  ;;  %v874_v19 = vsel %vm783_vm4, %v762_v8, 0.0 }
 0x293   :  { %v872_v17 = vsel %vm783_vm4, %v761_v10, 0.0  ;;  %v621_v0 = vadd.f32 %v620_v16, %v1641_v1 }
 0x294   :  { %v873_v18 = vadd.f32 %v872_v17, %v871_v13  ;;  %v764_v21 = vmax.f32 %v626_v14, 0.0 }
 0x295   :  { %v763_v22 = vmax.f32 %v621_v0, 0.0  ;;  %v1242_v23 = vpop.f32.mrb[14].mxu1 }
 0x296   :  { %v875_v24 = vadd.f32 %v874_v19, %v873_v18  ;;  %v636_v5 = vadd.f32 %v1242_v23, %v1641_v1  ;;  %v630_v26 = vpop.f32.mrb[15].mxu1  ;;  %v878_v30 = vsel %vm783_vm4, %v764_v21, 0.0 }
 0x297   :  { %v876_v27 = vsel %vm783_vm4, %v763_v22, 0.0  ;;  %v631_v28 = vadd.f32 %v630_v26, %v1641_v1 }
 0x298   :  { %v877_v29 = vadd.f32 %v876_v27, %v875_v24  ;;  %v766_v31 = vmax.f32 %v636_v5, 0.0 }
 0x299   :  { %v765_v32 = vmax.f32 %v631_v28, 0.0  ;;  %v1245_v9 = vpop.f32.mrb[16].mxu1 }
 0x29a   :  { %v879_v33 = vadd.f32 %v878_v30, %v877_v29  ;;  %v646_v34 = vadd.f32 %v1245_v9, %v1641_v1  ;;  %v640_v6 = vpop.f32.mrb[17].mxu1  ;;  %v882_v38 = vsel %vm783_vm4, %v766_v31, 0.0 }
 0x29b   :  { %v880_v35 = vsel %vm783_vm4, %v765_v32, 0.0  ;;  %v641_v36 = vadd.f32 %v640_v6, %v1641_v1 }
 0x29c   :  { %v881_v37 = vadd.f32 %v880_v35, %v879_v33  ;;  %v768_v39 = vmax.f32 %v646_v34, 0.0 }
 0x29d   :  { %v767_v40 = vmax.f32 %v641_v36, 0.0  ;;  %v1248_v41 = vpop.f32.mrb[18].mxu1 }
 0x29e   :  { %v883_v42 = vadd.f32 %v882_v38, %v881_v37  ;;  %v656_v15 = vadd.f32 %v1248_v41, %v1641_v1  ;;  %v650_v43 = vpop.f32.mrb[19].mxu1  ;;  %v886_v46 = vsel %vm783_vm4, %v768_v39, 0.0  ;;  %v847_v38 = vrot.slane %v1804_v12, 4 }
 0x29f   :  { %v884_v11 = vsel %vm783_vm4, %v767_v40, 0.0  ;;  %v651_v44 = vadd.f32 %v650_v43, %v1641_v1 }
 0x2a0   :  { %v885_v45 = vadd.f32 %v884_v11, %v883_v42  ;;  %v770_v47 = vmax.f32 %v656_v15, 0.0 }
 0x2a1   :  { %v769_v48 = vmax.f32 %v651_v44, 0.0  ;;  %v1251_v49 = vpop.f32.mrb[20].mxu1 }
 0x2a2   :  { %v887_v51 = vadd.f32 %v886_v46, %v885_v45  ;;  %v666_v52 = vadd.f32 %v1251_v49, %v1641_v1  ;;  %v660_v53 = vpop.f32.mrb[21].mxu1  ;;  %v890_v60 = vsel %vm783_vm4, %v770_v47, 0.0  ;;  %v848_v47 = vadd.f32 %v847_v38, %v1804_v12 }
 0x2a3   :  { %v888_v56 = vsel %vm783_vm4, %v769_v48, 0.0  ;;  %v661_v57 = vadd.f32 %v660_v53, %v1641_v1 }
 0x2a4   :  { %v889_v59 = vadd.f32 %v888_v56, %v887_v51  ;;  %v772_v62 = vmax.f32 %v666_v52, 0.0 }
 0x2a5   :  { %v771_v63 = vmax.f32 %v661_v57, 0.0  ;;  %v1254_v4 = vpop.f32.mrb[22].mxu1  ;;  %v849_v57 = vrot.slane %v848_v47, 2 }
 0x2a6   :  { %v891_v20 = vadd.f32 %v890_v60, %v889_v59  ;;  %v676_v50 = vadd.f32 %v1254_v4, %v1641_v1  ;;  %v670_v2 = vpop.f32.mrb[23].mxu1  ;;  %v894_v8 = vsel %vm783_vm4, %v772_v62, 0.0 }
 0x2a7   :  { %v892_v55 = vsel %vm783_vm4, %v771_v63, 0.0  ;;  %v671_v7 = vadd.f32 %v670_v2, %v1641_v1  ;;  %v850_v63 = vadd.f32 %v849_v57, %v848_v47 }
 0x2a8   :  { %v893_v58 = vadd.f32 %v892_v55, %v891_v20  ;;  %v774_v10 = vmax.f32 %v676_v50, 0.0 }
 0x2a9   :  { %v773_v61 = vmax.f32 %v671_v7, 0.0  ;;  %v1257_v13 = vpop.f32.mrb[24].mxu1  ;;  %v851_v50 = vrot.slane %v850_v63, 1 }
 0x2aa   :  { %v895_v14 = vadd.f32 %v894_v8, %v893_v58  ;;  %v686_v16 = vadd.f32 %v1257_v13, %v1641_v1  ;;  %v680_v17 = vpop.f32.mrb[25].mxu1  ;;  %v898_v21 = vsel %vm783_vm4, %v774_v10, 0.0 }
 0x2ab   :  { %v896_v0 = vsel %vm783_vm4, %v773_v61, 0.0  ;;  %v681_v18 = vadd.f32 %v680_v17, %v1641_v1  ;;  %v852_v12 = vadd.f32 %v851_v50, %v850_v63  ;;  %v926_v61 = vsub.s32 3, %v1398_v3 }
 0x2ac   :  { %v897_v19 = vadd.f32 %v896_v0, %v895_v14  ;;  %v776_v22 = vmax.f32 %v686_v16, 0.0 }
 0x2ad   :  { %v775_v23 = vmax.f32 %v681_v18, 0.0  ;;  %v1260_v24 = vpop.f32.mrb[26].mxu1  ;;  %v922_v58 = vmul.f32 0.00390625, %v852_v12  ;;  %v927_v13 = vrot.slane %v1622_v54, %v926_v61 }
 0x2ae   :  { %v899_v5 = vadd.f32 %v898_v21, %v897_v19  ;;  %v696_v26 = vadd.f32 %v1260_v24, %v1641_v1  ;;  %v690_v27 = vpop.f32.mrb[27].mxu1  ;;  %v902_v31 = vsel %vm783_vm4, %v776_v22, 0.0 }
 0x2af   :  { %v900_v28 = vsel %vm783_vm4, %v775_v23, 0.0  ;;  %v691_v29 = vadd.f32 %v690_v27, %v1641_v1 }
 0x2b0   :  { %v901_v30 = vadd.f32 %v900_v28, %v899_v5  ;;  %v778_v32 = vmax.f32 %v696_v26, 0.0 }
 0x2b1   :  { %v777_v9 = vmax.f32 %v691_v29, 0.0  ;;  %v1263_v33 = vpop.f32.mrb[28].mxu1 }
 0x2b2   :  { %v903_v34 = vadd.f32 %v902_v31, %v901_v30  ;;  %v706_v6 = vadd.f32 %v1263_v33, %v1641_v1  ;;  %v700_v35 = vpop.f32.mrb[29].mxu1  ;;  %v906_v40 = vsel %vm783_vm4, %v778_v32, 0.0 }
 0x2b3   :  { %v904_v36 = vsel %vm783_vm4, %v777_v9, 0.0  ;;  %v701_v37 = vadd.f32 %v700_v35, %v1641_v1 }
 0x2b4   :  { %v905_v39 = vadd.f32 %v904_v36, %v903_v34  ;;  %v780_v41 = vmax.f32 %v706_v6, 0.0 }
 0x2b5   :  { %v779_v42 = vmax.f32 %v701_v37, 0.0  ;;  %v1266_v15 = vpop.f32.mrb[30].mxu1 }
 0x2b6   :  { %v907_v43 = vadd.f32 %v906_v40, %v905_v39  ;;  %v716_v11 = vadd.f32 %v1266_v15, %v1641_v1  ;;  %v710_v44 = vpop.f32.mrb[31].mxu1  ;;  %v910_v49 = vsel %vm783_vm4, %v780_v41, 0.0 }
 0x2b7   :  { %v908_v45 = vsel %vm783_vm4, %v779_v42, 0.0  ;;  %v711_v46 = vadd.f32 %v710_v44, %v1641_v1 }
 0x2b8   :  { %v909_v48 = vadd.f32 %v908_v45, %v907_v43  ;;  %v782_v51 = vmax.f32 %v716_v11, 0.0 }
 0x2b9   :  { %v781_v52 = vmax.f32 %v711_v46, 0.0 }
 0x2ba   :  { %v911_v53 = vadd.f32 %v910_v49, %v909_v48  ;;  %v914_v60 = vsel %vm783_vm4, %v782_v51, 0.0 }
 0x2bb   :  { %v912_v56 = vsel %vm783_vm4, %v781_v52, 0.0 }
 0x2bc   :  { %v913_v59 = vadd.f32 %v912_v56, %v911_v53 }
 0x2be   :  { %v915_v62 = vadd.f32 %v914_v60, %v913_v59 }
 0x2c0   :  { %v916_v4 = vrot.slane %v915_v62, 4 }
 0x2c2   :  { %v917_v20 = vadd.f32 %v916_v4, %v915_v62 }
 0x2c4   :  { %v918_v1 = vrot.slane %v917_v20, 2 }
 0x2c6   :  { %v919_v2 = vadd.f32 %v918_v1, %v917_v20 }
 0x2c8   :  { %v920_v55 = vrot.slane %v919_v2, 1 }
 0x2ca   :  { %v921_v7 = vadd.f32 %v920_v55, %v919_v2 }
 0x2cc   :  { %v923_v8 = vmul.f32 0.00390625, %v921_v7 }
 0x2ce   :  { %v930_v10 = vsel %vm81_vm3, %v923_v8, %v922_v58 }
 0x2cf   :  { %1270 = vmatmul.mubr.msk.f32.vlgmr.msra.gmra.mrb[32].mxu1 %vm783_vm4, %v930_v10 }
 0x2d2   :  { %v1007_v18 = vpop.permute.xlu1 %1006 }
 0x3a2   :  { %v999_v14 = vpop.f32.mrb[32].mxu1 }
 0x3a3   :  { %v1000_v16 = vadd.f32 %v999_v14, %v927_v13  ;;  %v1271_v17 = vpop.f32.mrb[33].mxu1 }
 0x3a5   :  { %1010 = vrot.lane.b32.xlu1 %v1000_v16, %s1359_s4  ;;  %v1003_v0 = vadd.f32 %v1000_v16, %v1816_v25 }
 0x3a7   :  { %v1004_v19 = vmul.f32 0.5, %v1003_v0 }
 0x3a9   :  { %v1014_v22 = vsel %vm1013_vm5, %v1004_v19, %v1007_v18 }
 0x417   :  { %v1011_v21 = vpop.permute.xlu1 %1010 }
 0x418   :  { %v1015_v23 = vsel %vm783_vm4, %v1014_v22, %v1011_v21 }
 0x419   :  { %1017 = vst.msk [vmem:[%s1896_s6] sm:$0x3] %vm1016_vm6, %v1015_v23 }

</bundles_post_ra>
